<compile_context>
chip_gen: v6e
topology: v6e:2x2x1
jax: 0.10.0
libtpu: 0.0.40
codegen_flags: <defaults>
</compile_context>

<pallas_src>
import math
import functools

import jax
import jax.numpy as jnp
import numpy as np
from jax.experimental import pallas as pl
from jax.experimental.pallas import tpu as pltpu

# ---------------- model hyper-params (small, consistent with the module) -------
D_MODEL = 32
N_HEADS = 4
D_HEAD = 8
N_GROUPS = 2
DROPOUT_P = 0.0  # inference
D_FF = 4 * D_MODEL
LN_EPS = 1e-5


def _layernorm(x, gamma, beta):
    mu = jnp.mean(x, axis=-1, keepdims=True)
    var = jnp.mean((x - mu) ** 2, axis=-1, keepdims=True)
    return (x - mu) * jax.lax.rsqrt(var + LN_EPS) * gamma + beta


# =============================== Pallas kernel ================================
def gqa_block_stack_kernel(
    x_ref,      # (S, dm)   f32   one sequence (selected by grid axis 0)
    wqkv_ref,   # (1, dm, 3*H*D)  bf16  layer-l fused Q|K|V weights (scale & GQA folded)
    bqkv_ref,   # (1, 1, 3*H*D)   f32
    wo_ref,     # (1, H*D, dm)    bf16
    vecs_ref,   # (1, 6, dm)      f32   rows: g1, be1, g2, be2, bo, bf2
    w1_ref,     # (1, dm, d_ff)   bf16
    bf1_ref,    # (1, 1, d_ff)    f32
    w2_ref,     # (1, d_ff, dm)   bf16
    out_ref,    # (S, dm)   f32
    act_ref,    # (S, dm)   f32   VMEM scratch: activation carried across layers
    *, n_heads, d_head,
):
    l = pl.program_id(1)
    S = x_ref.shape[0]
    H, D = n_heads, d_head
    HD = H * D
    bf16 = jnp.bfloat16
    f32 = jnp.float32

    # layer 0: load the residual-stream input for this sequence
    @pl.when(l == 0)
    def _():
        act_ref[...] = x_ref[...]

    x = act_ref[...]                                   # (S, dm) f32

    vecs = vecs_ref[0]                                 # (6, dm)
    g1, be1 = vecs[0:1, :], vecs[1:2, :]
    g2, be2 = vecs[2:3, :], vecs[3:4, :]
    bo, bf2 = vecs[4:5, :], vecs[5:6, :]

    # ---- ln1 (f32 VPU math) ----
    h = _layernorm(x, g1, be1)                         # (S, dm)

    # ---- single lane-dense QKV projection: one MXU op, bf16 ops, f32 acc ----
    qkv = jnp.dot(h.astype(bf16), wqkv_ref[0],
                  preferred_element_type=f32) + bqkv_ref[0]        # (S, 3*H*D)

    # head-major views built only for the two attention contractions
    def to_heads(t2d):                                  # (S, H*D) -> (H, S, D)
        return jnp.stack([t2d[:, i * D:(i + 1) * D] for i in range(H)], axis=0)

    q = to_heads(qkv[:, 0:HD])                          # scale already folded in
    k = to_heads(qkv[:, HD:2 * HD])                     # group weights duplicated per head
    v = to_heads(qkv[:, 2 * HD:3 * HD])

    # ---- attention (batched over heads), causal mask generated in-kernel ----
    s = jnp.einsum("hqd,hkd->hqk", q.astype(bf16), k.astype(bf16),
                   preferred_element_type=f32)          # (H, S, S)
    row = jax.lax.broadcasted_iota(jnp.int32, (S, S), 0)
    col = jax.lax.broadcasted_iota(jnp.int32, (S, S), 1)
    s = jnp.where(row >= col, s, -1e30)

    m = jnp.max(s, axis=-1, keepdims=True)
    e = jnp.exp(s - m)
    p = e * pl.reciprocal(jnp.sum(e, axis=-1, keepdims=True))      # exact recip
    # attention dropout: identity (dropout_p == 0, eval mode)

    ctx = jnp.einsum("hqk,hkd->hqd", p.astype(bf16), v.astype(bf16),
                     preferred_element_type=f32)        # (H, S, D)

    # ---- lane-concat heads back to (S, H*D); single out_proj matmul ----
    ctx2d = jnp.concatenate([ctx[i] for i in range(H)], axis=1)    # (S, H*D)
    attn = jnp.dot(ctx2d.astype(bf16), wo_ref[0],
                   preferred_element_type=f32) + bo                # (S, dm)
    x1 = x + attn

    # ---- ln2 + feed-forward (Linear -> ReLU -> Linear) + residual ----
    h2 = _layernorm(x1, g2, be2)
    ff = jnp.dot(h2.astype(bf16), w1_ref[0],
                 preferred_element_type=f32) + bf1_ref[0]
    ff = jnp.maximum(ff, 0.0)
    ff = jnp.dot(ff.astype(bf16), w2_ref[0],
                 preferred_element_type=f32) + bf2
    y = x1 + ff

    act_ref[...] = y                                    # carry to next layer

    @pl.when(l == pl.num_programs(1) - 1)
    def _():
        out_ref[...] = y


# ========================= wrapper-side parameter packing =====================
def pack_layer(p):
    """Pack one Block_GQA layer's params into the kernel layout (trace-time)."""
    dm, H, D, G = D_MODEL, N_HEADS, D_HEAD, N_GROUPS
    gs = H // G
    scale = 1.0 / math.sqrt(D)
    gidx = np.arange(H) // gs                                       # group per head

    # 1/sqrt(D) folded into Q weights & bias; GQA group sharing folded by
    # duplicating the K/V group columns per head (no gather in the kernel).
    wq = p["wq"] * scale                                            # (dm, H*D)
    wk = p["wk"].reshape(dm, G, D)[:, gidx].reshape(dm, H * D)
    wv = p["wv"].reshape(dm, G, D)[:, gidx].reshape(dm, H * D)
    wqkv = jnp.concatenate([wq, wk, wv], axis=1).astype(jnp.bfloat16)   # (dm, 3HD)

    bq = p["bq"] * scale
    bk = p["bk"].reshape(1, G, D)[:, gidx].reshape(1, H * D)
    bv = p["bv"].reshape(1, G, D)[:, gidx].reshape(1, H * D)
    bqkv = jnp.concatenate([bq, bk, bv], axis=1)                        # (1, 3HD) f32

    vecs = jnp.concatenate([p["g1"], p["be1"], p["g2"],
                            p["be2"], p["bo"], p["bf2"]], 0)            # (6, dm) f32

    return dict(
        wqkv=wqkv,
        bqkv=bqkv,
        wo=p["wo"].astype(jnp.bfloat16),                                # (H*D, dm)
        vecs=vecs,
        w1=p["w1"].astype(jnp.bfloat16),                                # (dm, d_ff)
        bf1=p["bf1"],                                                   # (1, d_ff)
        w2=p["w2"].astype(jnp.bfloat16),                                # (d_ff, dm)
    )


def stack_layers(layer_params):
    packed = [pack_layer(p) for p in layer_params]
    return {k: jnp.stack([pk[k] for pk in packed], axis=0) for k in packed[0]}


def gqa_blocks(x, packed):
    """Run L fused Block_GQA layers in one pallas_call. x: (B, S, dm) f32."""
    B, S, dm = x.shape
    L = packed["wqkv"].shape[0]
    x2d = x.reshape(B * S, dm)

    in_specs = [
        pl.BlockSpec((S, dm), lambda b, l: (b, 0)),                                   # x
        pl.BlockSpec((1,) + packed["wqkv"].shape[1:], lambda b, l: (l, 0, 0)),
        pl.BlockSpec((1,) + packed["bqkv"].shape[1:], lambda b, l: (l, 0, 0)),
        pl.BlockSpec((1,) + packed["wo"].shape[1:],   lambda b, l: (l, 0, 0)),
        pl.BlockSpec((1,) + packed["vecs"].shape[1:], lambda b, l: (l, 0, 0)),
        pl.BlockSpec((1,) + packed["w1"].shape[1:],   lambda b, l: (l, 0, 0)),
        pl.BlockSpec((1,) + packed["bf1"].shape[1:],  lambda b, l: (l, 0, 0)),
        pl.BlockSpec((1,) + packed["w2"].shape[1:],   lambda b, l: (l, 0, 0)),
    ]
    out_spec = pl.BlockSpec((S, dm), lambda b, l: (b, 0))

    kernel = functools.partial(gqa_block_stack_kernel, n_heads=N_HEADS, d_head=D_HEAD)

    out2d = pl.pallas_call(
        kernel,
        out_shape=jax.ShapeDtypeStruct((B * S, dm), jnp.float32),
        grid_spec=pltpu.PrefetchScalarGridSpec(
            num_scalar_prefetch=0,
            grid=(B, L),                       # sequences parallel, layers sequential
            in_specs=in_specs,
            out_specs=out_spec,
            scratch_shapes=[pltpu.VMEM((S, dm), jnp.float32)],   # activation carry
        ),
        compiler_params=pltpu.CompilerParams(
            dimension_semantics=("parallel", "arbitrary")),
    )(x2d, packed["wqkv"], packed["bqkv"], packed["wo"], packed["vecs"],
      packed["w1"], packed["bf1"], packed["w2"])
    return out2d.reshape(B, S, dm)


def block_gqa(x, params):
    """Single Block_GQA forward via the fused kernel (L = 1)."""
    return gqa_blocks(x, stack_layers([params]))


def gptlite_gqa(ids, mp):
    """Full GPTlite_GQA forward: embeddings (JAX) -> fused Pallas block stack ->
    final LayerNorm + LM head (JAX)."""
    S = ids.shape[1]
    x = jnp.take(mp["tok"], ids, axis=0) + mp["pos"][None, :S, :]
    x = gqa_blocks(x, stack_layers(mp["blocks"]))
    x = _layernorm(x, mp["g_f"], mp["b_f"])
    return x @ mp["w_out"] + mp["b_out"]


# ---------------- pure-JAX references (mirror the PyTorch forward) -------------
def block_gqa_ref(x, p):
    B, S, dm = x.shape
    H, D, G = N_HEADS, D_HEAD, N_GROUPS
    gs = H // G

    h = _layernorm(x, p["g1"], p["be1"])
    q = h @ p["wq"] + p["bq"]
    k = h @ p["wk"] + p["bk"]
    v = h @ p["wv"] + p["bv"]
    q = q.reshape(B, S, H, D).transpose(0, 2, 1, 3)
    k = k.reshape(B, S, G, D).transpose(0, 2, 1, 3)
    v = v.reshape(B, S, G, D).transpose(0, 2, 1, 3)
    gidx = jnp.arange(H) // gs
    k = k[:, gidx]            # (B, H, S, D)
    v = v[:, gidx]
    s = jnp.einsum("bhqd,bhkd->bhqk", q, k) / math.sqrt(D)
    mask = jnp.tril(jnp.ones((S, S), bool))
    s = jnp.where(mask, s, -1e30)
    pw = jax.nn.softmax(s, -1)
    o = jnp.einsum("bhqk,bhkd->bhqd", pw, v).transpose(0, 2, 1, 3).reshape(B, S, H * D)
    o = o @ p["wo"] + p["bo"]
    x1 = x + o
    h2 = _layernorm(x1, p["g2"], p["be2"])
    ff = jnp.maximum(h2 @ p["w1"] + p["bf1"], 0.0) @ p["w2"] + p["bf2"]
    return x1 + ff


def gptlite_gqa_ref(ids, mp):
    S = ids.shape[1]
    x = jnp.take(mp["tok"], ids, axis=0) + mp["pos"][None, :S, :]
    for p in mp["blocks"]:
        x = block_gqa_ref(x, p)
    x = _layernorm(x, mp["g_f"], mp["b_f"])
    return x @ mp["w_out"] + mp["b_out"]


# ------------------------------- parameter init --------------------------------
def init_block_params(key):
    keys = jax.random.split(key, 12)
    std = 0.02

    def W(k, i, o):
        return jax.random.normal(k, (i, o), jnp.float32) * std

    return {
        "wq": W(keys[0], D_MODEL, N_HEADS * D_HEAD),
        "bq": jax.random.normal(keys[1], (1, N_HEADS * D_HEAD), jnp.float32) * std,
        "wk": W(keys[2], D_MODEL, N_GROUPS * D_HEAD),
        "bk": jax.random.normal(keys[3], (1, N_GROUPS * D_HEAD), jnp.float32) * std,
        "wv": W(keys[4], D_MODEL, N_GROUPS * D_HEAD),
        "bv": jax.random.normal(keys[5], (1, N_GROUPS * D_HEAD), jnp.float32) * std,
        "wo": W(keys[6], N_HEADS * D_HEAD, D_MODEL),
        "bo": jax.random.normal(keys[7], (1, D_MODEL), jnp.float32) * std,
        "g1": jnp.ones((1, D_MODEL), jnp.float32),
        "be1": jnp.zeros((1, D_MODEL), jnp.float32),
        "g2": jnp.ones((1, D_MODEL), jnp.float32),
        "be2": jnp.zeros((1, D_MODEL), jnp.float32),
        "w1": W(keys[8], D_MODEL, D_FF),
        "bf1": jax.random.normal(keys[9], (1, D_FF), jnp.float32) * std,
        "w2": W(keys[10], D_FF, D_MODEL),
        "bf2": jax.random.normal(keys[11], (1, D_MODEL), jnp.float32) * std,
    }


def init_gpt_params(key, vocab_size, seqlen, n_layers):
    ks = jax.random.split(key, n_layers + 4)
    blocks = [init_block_params(ks[i]) for i in range(n_layers)]
    std = 0.02
    return {
        "blocks": blocks,
        "tok": jax.random.normal(ks[n_layers], (vocab_size, D_MODEL), jnp.float32) * std,
        "pos": jax.random.normal(ks[n_layers + 1], (seqlen, D_MODEL), jnp.float32) * std,
        "g_f": jnp.ones((1, D_MODEL), jnp.float32),
        "b_f": jnp.zeros((1, D_MODEL), jnp.float32),
        "w_out": jax.random.normal(ks[n_layers + 2], (D_MODEL, vocab_size), jnp.float32) * std,
        "b_out": jax.random.normal(ks[n_layers + 3], (1, vocab_size), jnp.float32) * std,
    }


if __name__ == "__main__":
    # TODO(synk): dropout with p>0 (training mode) is not implemented; eval-mode identity only.
    B, S = 2, 8
    key = jax.random.PRNGKey(0)
    kx, kp, kids, kgpt = jax.random.split(key, 4)

    # ---- single Block_GQA (L = 1) ----
    x = jax.random.normal(kx, (B, S, D_MODEL), jnp.float32)
    params = init_block_params(kp)
    out = jax.block_until_ready(block_gqa(x, params))
    ref = jax.block_until_ready(block_gqa_ref(x, params))
    # tolerance reflects bf16 MXU operands (f32 accumulation, f32 elementwise math)
    np.testing.assert_allclose(np.asarray(out), np.asarray(ref), atol=3e-2, rtol=3e-2)

    # ---- full GPTlite_GQA: embeddings + 2 blocks fused in ONE pallas_call + head ----
    VOCAB, N_LAYERS = 64, 2
    mp = init_gpt_params(kgpt, VOCAB, S, N_LAYERS)
    ids = jax.random.randint(kids, (B, S), 0, VOCAB)
    logits = jax.block_until_ready(gptlite_gqa(ids, mp))
    logits_ref = jax.block_until_ready(gptlite_gqa_ref(ids, mp))
    np.testing.assert_allclose(np.asarray(logits), np.asarray(logits_ref), atol=5e-2, rtol=5e-2)

    print("KERNEL_OK")
</pallas_src>

<mosaic_0001>
module attributes {stable_mosaic.version = 11 : i64} {
  func.func @gqa_block_stack_kernel(%arg0: i32, %arg1: i32, %arg2: memref<8x32xf32, #tpu.memory_space<vmem>>, %arg3: memref<1x32x96xbf16, #tpu.memory_space<vmem>>, %arg4: memref<1x1x96xf32, #tpu.memory_space<vmem>>, %arg5: memref<1x32x32xbf16, #tpu.memory_space<vmem>>, %arg6: memref<1x6x32xf32, #tpu.memory_space<vmem>>, %arg7: memref<1x32x128xbf16, #tpu.memory_space<vmem>>, %arg8: memref<1x1x128xf32, #tpu.memory_space<vmem>>, %arg9: memref<1x128x32xbf16, #tpu.memory_space<vmem>>, %arg10: memref<8x32xf32, #tpu.memory_space<vmem>>, %arg11: memref<8x32xf32, #tpu.memory_space<vmem>>) attributes {dimension_semantics = [#tpu.dimension_semantics<parallel>, #tpu.dimension_semantics<arbitrary>], iteration_bounds = array<i64: 2, 1>, scalar_prefetch = 0 : i64, scratch_operands = 1 : i64, tpu.core_type = #tpu.core_type<tc>, window_params = [{transform_indices = @transform_0, window_bounds = array<i64: 8, 32>}, {transform_indices = @transform_1, window_bounds = array<i64: 1, 32, 96>}, {transform_indices = @transform_2, window_bounds = array<i64: 1, 1, 96>}, {transform_indices = @transform_3, window_bounds = array<i64: 1, 32, 32>}, {transform_indices = @transform_4, window_bounds = array<i64: 1, 6, 32>}, {transform_indices = @transform_5, window_bounds = array<i64: 1, 32, 128>}, {transform_indices = @transform_6, window_bounds = array<i64: 1, 1, 128>}, {transform_indices = @transform_7, window_bounds = array<i64: 1, 128, 32>}, {transform_indices = @transform_8, window_bounds = array<i64: 8, 32>}]} {
    %c0_i32 = arith.constant 0 : i32
    %0 = arith.cmpi eq, %arg1, %c0_i32 : i32
    %1 = arith.extui %0 : i1 to i32
    %c0_i32_0 = arith.constant 0 : i32
    %2 = arith.cmpi ne, %1, %c0_i32_0 : i32
    scf.if %2 {
      %c0_46 = arith.constant 0 : index
      %c0_47 = arith.constant 0 : index
      %154 = vector.load %arg2[%c0_46, %c0_47] : memref<8x32xf32, #tpu.memory_space<vmem>>, vector<8x32xf32>
      %c0_48 = arith.constant 0 : index
      %c0_49 = arith.constant 0 : index
      %155 = vector.load %arg11[%c0_48, %c0_49] : memref<8x32xf32, #tpu.memory_space<vmem>>, vector<8x32xf32>
      tpu.vector_store %arg11[%c0_48, %c0_49], %154 {strides = array<i32>} : memref<8x32xf32, #tpu.memory_space<vmem>>, vector<8x32xf32>,
    } else {
    }
    %c0 = arith.constant 0 : index
    %c0_1 = arith.constant 0 : index
    %3 = vector.load %arg11[%c0, %c0_1] : memref<8x32xf32, #tpu.memory_space<vmem>>, vector<8x32xf32>
    %c0_2 = arith.constant 0 : index
    %c0_3 = arith.constant 0 : index
    %c0_4 = arith.constant 0 : index
    %4 = vector.load %arg6[%c0_2, %c0_3, %c0_4] : memref<1x6x32xf32, #tpu.memory_space<vmem>>, vector<1x6x32xf32>
    %5 = vector.shape_cast %4 : vector<1x6x32xf32> to vector<6x32xf32>
    %6 = vector.extract_strided_slice %5 {offsets = [0, 0], sizes = [1, 32], strides = [1, 1]} : vector<6x32xf32> to vector<1x32xf32>
    %7 = vector.extract_strided_slice %5 {offsets = [1, 0], sizes = [1, 32], strides = [1, 1]} : vector<6x32xf32> to vector<1x32xf32>
    %8 = vector.extract_strided_slice %5 {offsets = [2, 0], sizes = [1, 32], strides = [1, 1]} : vector<6x32xf32> to vector<1x32xf32>
    %9 = vector.extract_strided_slice %5 {offsets = [3, 0], sizes = [1, 32], strides = [1, 1]} : vector<6x32xf32> to vector<1x32xf32>
    %10 = vector.extract_strided_slice %5 {offsets = [4, 0], sizes = [1, 32], strides = [1, 1]} : vector<6x32xf32> to vector<1x32xf32>
    %11 = vector.extract_strided_slice %5 {offsets = [5, 0], sizes = [1, 32], strides = [1, 1]} : vector<6x32xf32> to vector<1x32xf32>
    %cst = arith.constant dense<0.000000e+00> : vector<8xf32>
    %12 = vector.multi_reduction <add>, %3, %cst [1] : vector<8x32xf32> to vector<8xf32>
    %13 = vector.shape_cast %12 : vector<8xf32> to vector<8x1xf32>
    %cst_5 = arith.constant 3.200000e+01 : f32
    %14 = vector.broadcast %cst_5 : f32 to vector<8x1xf32>
    %15 = arith.divf %13, %14 : vector<8x1xf32>
    %16 = vector.broadcast %15 : vector<8x1xf32> to vector<8x32xf32>
    %17 = arith.subf %3, %16 : vector<8x32xf32>
    %18 = arith.mulf %17, %17 : vector<8x32xf32>
    %cst_6 = arith.constant dense<0.000000e+00> : vector<8xf32>
    %19 = vector.multi_reduction <add>, %18, %cst_6 [1] : vector<8x32xf32> to vector<8xf32>
    %20 = vector.shape_cast %19 : vector<8xf32> to vector<8x1xf32>
    %cst_7 = arith.constant 3.200000e+01 : f32
    %21 = vector.broadcast %cst_7 : f32 to vector<8x1xf32>
    %22 = arith.divf %20, %21 : vector<8x1xf32>
    %23 = vector.broadcast %15 : vector<8x1xf32> to vector<8x32xf32>
    %24 = arith.subf %3, %23 : vector<8x32xf32>
    %cst_8 = arith.constant 9.99999974E-6 : f32
    %25 = vector.broadcast %cst_8 : f32 to vector<8x1xf32>
    %26 = arith.addf %22, %25 : vector<8x1xf32>
    %27 = math.rsqrt %26 : vector<8x1xf32>
    %28 = vector.broadcast %27 : vector<8x1xf32> to vector<8x32xf32>
    %29 = arith.mulf %24, %28 : vector<8x32xf32>
    %30 = vector.broadcast %6 : vector<1x32xf32> to vector<8x32xf32>
    %31 = arith.mulf %29, %30 : vector<8x32xf32>
    %32 = vector.broadcast %7 : vector<1x32xf32> to vector<8x32xf32>
    %33 = arith.addf %31, %32 : vector<8x32xf32>
    %34 = arith.truncf %33 : vector<8x32xf32> to vector<8x32xbf16>
    %c0_9 = arith.constant 0 : index
    %c0_10 = arith.constant 0 : index
    %c0_11 = arith.constant 0 : index
    %35 = vector.load %arg3[%c0_9, %c0_10, %c0_11] : memref<1x32x96xbf16, #tpu.memory_space<vmem>>, vector<1x32x96xbf16>
    %36 = vector.shape_cast %35 : vector<1x32x96xbf16> to vector<32x96xbf16>
    %cst_12 = arith.constant dense<0.000000e+00> : vector<8x96xf32>
    %37 = tpu.matmul %34, %36, %cst_12 {dimension_numbers = #tpu.dot_dimension_numbers<[1], [0], [0], [1], [0, 0, 1, 1], [], []>} : vector<8x32xbf16>, vector<32x96xbf16>, vector<8x96xf32> -> vector<8x96xf32>
    %c0_13 = arith.constant 0 : index
    %c0_14 = arith.constant 0 : index
    %c0_15 = arith.constant 0 : index
    %38 = vector.load %arg4[%c0_13, %c0_14, %c0_15] : memref<1x1x96xf32, #tpu.memory_space<vmem>>, vector<1x1x96xf32>
    %39 = vector.shape_cast %38 : vector<1x1x96xf32> to vector<1x96xf32>
    %40 = vector.broadcast %39 : vector<1x96xf32> to vector<8x96xf32>
    %41 = arith.addf %37, %40 : vector<8x96xf32>
    %42 = vector.extract_strided_slice %41 {offsets = [0, 0], sizes = [8, 32], strides = [1, 1]} : vector<8x96xf32> to vector<8x32xf32>
    %43 = vector.extract_strided_slice %42 {offsets = [0, 0], sizes = [8, 8], strides = [1, 1]} : vector<8x32xf32> to vector<8x8xf32>
    %44 = vector.extract_strided_slice %42 {offsets = [0, 8], sizes = [8, 8], strides = [1, 1]} : vector<8x32xf32> to vector<8x8xf32>
    %45 = vector.extract_strided_slice %42 {offsets = [0, 16], sizes = [8, 8], strides = [1, 1]} : vector<8x32xf32> to vector<8x8xf32>
    %46 = vector.extract_strided_slice %42 {offsets = [0, 24], sizes = [8, 8], strides = [1, 1]} : vector<8x32xf32> to vector<8x8xf32>
    %47 = vector.shape_cast %43 : vector<8x8xf32> to vector<1x8x8xf32>
    %48 = vector.shape_cast %44 : vector<8x8xf32> to vector<1x8x8xf32>
    %49 = vector.shape_cast %45 : vector<8x8xf32> to vector<1x8x8xf32>
    %50 = vector.shape_cast %46 : vector<8x8xf32> to vector<1x8x8xf32>
    %51 = tpu.concatenate %47, %48, %49, %50 in 0 : vector<1x8x8xf32>, vector<1x8x8xf32>, vector<1x8x8xf32>, vector<1x8x8xf32> -> vector<4x8x8xf32>
    %52 = vector.extract_strided_slice %41 {offsets = [0, 32], sizes = [8, 32], strides = [1, 1]} : vector<8x96xf32> to vector<8x32xf32>
    %53 = vector.extract_strided_slice %52 {offsets = [0, 0], sizes = [8, 8], strides = [1, 1]} : vector<8x32xf32> to vector<8x8xf32>
    %54 = vector.extract_strided_slice %52 {offsets = [0, 8], sizes = [8, 8], strides = [1, 1]} : vector<8x32xf32> to vector<8x8xf32>
    %55 = vector.extract_strided_slice %52 {offsets = [0, 16], sizes = [8, 8], strides = [1, 1]} : vector<8x32xf32> to vector<8x8xf32>
    %56 = vector.extract_strided_slice %52 {offsets = [0, 24], sizes = [8, 8], strides = [1, 1]} : vector<8x32xf32> to vector<8x8xf32>
    %57 = vector.shape_cast %53 : vector<8x8xf32> to vector<1x8x8xf32>
    %58 = vector.shape_cast %54 : vector<8x8xf32> to vector<1x8x8xf32>
    %59 = vector.shape_cast %55 : vector<8x8xf32> to vector<1x8x8xf32>
    %60 = vector.shape_cast %56 : vector<8x8xf32> to vector<1x8x8xf32>
    %61 = tpu.concatenate %57, %58, %59, %60 in 0 : vector<1x8x8xf32>, vector<1x8x8xf32>, vector<1x8x8xf32>, vector<1x8x8xf32> -> vector<4x8x8xf32>
    %62 = vector.extract_strided_slice %41 {offsets = [0, 64], sizes = [8, 32], strides = [1, 1]} : vector<8x96xf32> to vector<8x32xf32>
    %63 = vector.extract_strided_slice %62 {offsets = [0, 0], sizes = [8, 8], strides = [1, 1]} : vector<8x32xf32> to vector<8x8xf32>
    %64 = vector.extract_strided_slice %62 {offsets = [0, 8], sizes = [8, 8], strides = [1, 1]} : vector<8x32xf32> to vector<8x8xf32>
    %65 = vector.extract_strided_slice %62 {offsets = [0, 16], sizes = [8, 8], strides = [1, 1]} : vector<8x32xf32> to vector<8x8xf32>
    %66 = vector.extract_strided_slice %62 {offsets = [0, 24], sizes = [8, 8], strides = [1, 1]} : vector<8x32xf32> to vector<8x8xf32>
    %67 = vector.shape_cast %63 : vector<8x8xf32> to vector<1x8x8xf32>
    %68 = vector.shape_cast %64 : vector<8x8xf32> to vector<1x8x8xf32>
    %69 = vector.shape_cast %65 : vector<8x8xf32> to vector<1x8x8xf32>
    %70 = vector.shape_cast %66 : vector<8x8xf32> to vector<1x8x8xf32>
    %71 = tpu.concatenate %67, %68, %69, %70 in 0 : vector<1x8x8xf32>, vector<1x8x8xf32>, vector<1x8x8xf32>, vector<1x8x8xf32> -> vector<4x8x8xf32>
    %72 = arith.truncf %51 : vector<4x8x8xf32> to vector<4x8x8xbf16>
    %73 = arith.truncf %61 : vector<4x8x8xf32> to vector<4x8x8xbf16>
    "tpu.trace_start"() <{level = 10 : i32, message = "hqd,hkd->hqk"}> : () -> ()
    %cst_16 = arith.constant dense<0.000000e+00> : vector<4x8x8xf32>
    %74 = tpu.matmul %72, %73, %cst_16 {dimension_numbers = #tpu.dot_dimension_numbers<[2], [2], [1], [1], [0, 0, 0, 1, 1, 1], [0], [0]>} : vector<4x8x8xbf16>, vector<4x8x8xbf16>, vector<4x8x8xf32> -> vector<4x8x8xf32>
    "tpu.trace_stop"() : () -> ()
    %75 = tpu.iota {dimensions = array<i32: 0>} : vector<8x8xi32>
    %76 = tpu.iota {dimensions = array<i32: 1>} : vector<8x8xi32>
    %77 = arith.cmpi sge, %75, %76 : vector<8x8xi32>
    %cst_17 = arith.constant -1.000000e+30 : f32
    %78 = vector.shape_cast %77 : vector<8x8xi1> to vector<1x8x8xi1>
    %79 = vector.broadcast %78 : vector<1x8x8xi1> to vector<4x8x8xi1>
    %80 = vector.broadcast %cst_17 : f32 to vector<4x8x8xf32>
    %81 = arith.select %79, %74, %80 : vector<4x8x8xi1>, vector<4x8x8xf32>
    %cst_18 = arith.constant dense<0xFF800000> : vector<4x8xf32>
    %82 = vector.multi_reduction <maximumf>, %81, %cst_18 [2] : vector<4x8x8xf32> to vector<4x8xf32>
    %83 = vector.shape_cast %82 : vector<4x8xf32> to vector<4x8x1xf32>
    %84 = vector.broadcast %83 : vector<4x8x1xf32> to vector<4x8x8xf32>
    %85 = arith.subf %81, %84 : vector<4x8x8xf32>
    %86 = math.exp %85 : vector<4x8x8xf32>
    %cst_19 = arith.constant dense<0.000000e+00> : vector<4x8xf32>
    %87 = vector.multi_reduction <add>, %86, %cst_19 [2] : vector<4x8x8xf32> to vector<4x8xf32>
    %88 = vector.shape_cast %87 : vector<4x8xf32> to vector<4x8x1xf32>
    %89 = tpu.reciprocal %88 : vector<4x8x1xf32> -> vector<4x8x1xf32>
    %90 = vector.broadcast %89 : vector<4x8x1xf32> to vector<4x8x8xf32>
    %91 = arith.mulf %86, %90 : vector<4x8x8xf32>
    %92 = arith.truncf %91 : vector<4x8x8xf32> to vector<4x8x8xbf16>
    %93 = arith.truncf %71 : vector<4x8x8xf32> to vector<4x8x8xbf16>
    "tpu.trace_start"() <{level = 10 : i32, message = "hqk,hkd->hqd"}> : () -> ()
    %cst_20 = arith.constant dense<0.000000e+00> : vector<4x8x8xf32>
    %94 = tpu.matmul %92, %93, %cst_20 {dimension_numbers = #tpu.dot_dimension_numbers<[2], [1], [1], [2], [0, 0, 0, 1, 1, 2], [0], [0]>} : vector<4x8x8xbf16>, vector<4x8x8xbf16>, vector<4x8x8xf32> -> vector<4x8x8xf32>
    "tpu.trace_stop"() : () -> ()
    %95 = vector.extract_strided_slice %94 {offsets = [0, 0, 0], sizes = [1, 8, 8], strides = [1, 1, 1]} : vector<4x8x8xf32> to vector<1x8x8xf32>
    %96 = vector.shape_cast %95 : vector<1x8x8xf32> to vector<8x8xf32>
    %97 = vector.extract_strided_slice %94 {offsets = [1, 0, 0], sizes = [1, 8, 8], strides = [1, 1, 1]} : vector<4x8x8xf32> to vector<1x8x8xf32>
    %98 = vector.shape_cast %97 : vector<1x8x8xf32> to vector<8x8xf32>
    %99 = vector.extract_strided_slice %94 {offsets = [2, 0, 0], sizes = [1, 8, 8], strides = [1, 1, 1]} : vector<4x8x8xf32> to vector<1x8x8xf32>
    %100 = vector.shape_cast %99 : vector<1x8x8xf32> to vector<8x8xf32>
    %101 = vector.extract_strided_slice %94 {offsets = [3, 0, 0], sizes = [1, 8, 8], strides = [1, 1, 1]} : vector<4x8x8xf32> to vector<1x8x8xf32>
    %102 = vector.shape_cast %101 : vector<1x8x8xf32> to vector<8x8xf32>
    %103 = tpu.concatenate %96, %98, %100, %102 in 1 : vector<8x8xf32>, vector<8x8xf32>, vector<8x8xf32>, vector<8x8xf32> -> vector<8x32xf32>
    %104 = arith.truncf %103 : vector<8x32xf32> to vector<8x32xbf16>
    %c0_21 = arith.constant 0 : index
    %c0_22 = arith.constant 0 : index
    %c0_23 = arith.constant 0 : index
    %105 = vector.load %arg5[%c0_21, %c0_22, %c0_23] : memref<1x32x32xbf16, #tpu.memory_space<vmem>>, vector<1x32x32xbf16>
    %106 = vector.shape_cast %105 : vector<1x32x32xbf16> to vector<32x32xbf16>
    %cst_24 = arith.constant dense<0.000000e+00> : vector<8x32xf32>
    %107 = tpu.matmul %104, %106, %cst_24 {dimension_numbers = #tpu.dot_dimension_numbers<[1], [0], [0], [1], [0, 0, 1, 1], [], []>} : vector<8x32xbf16>, vector<32x32xbf16>, vector<8x32xf32> -> vector<8x32xf32>
    %108 = vector.broadcast %10 : vector<1x32xf32> to vector<8x32xf32>
    %109 = arith.addf %107, %108 : vector<8x32xf32>
    %110 = arith.addf %3, %109 : vector<8x32xf32>
    %cst_25 = arith.constant dense<0.000000e+00> : vector<8xf32>
    %111 = vector.multi_reduction <add>, %110, %cst_25 [1] : vector<8x32xf32> to vector<8xf32>
    %112 = vector.shape_cast %111 : vector<8xf32> to vector<8x1xf32>
    %cst_26 = arith.constant 3.200000e+01 : f32
    %113 = vector.broadcast %cst_26 : f32 to vector<8x1xf32>
    %114 = arith.divf %112, %113 : vector<8x1xf32>
    %115 = vector.broadcast %114 : vector<8x1xf32> to vector<8x32xf32>
    %116 = arith.subf %110, %115 : vector<8x32xf32>
    %117 = arith.mulf %116, %116 : vector<8x32xf32>
    %cst_27 = arith.constant dense<0.000000e+00> : vector<8xf32>
    %118 = vector.multi_reduction <add>, %117, %cst_27 [1] : vector<8x32xf32> to vector<8xf32>
    %119 = vector.shape_cast %118 : vector<8xf32> to vector<8x1xf32>
    %cst_28 = arith.constant 3.200000e+01 : f32
    %120 = vector.broadcast %cst_28 : f32 to vector<8x1xf32>
    %121 = arith.divf %119, %120 : vector<8x1xf32>
    %122 = vector.broadcast %114 : vector<8x1xf32> to vector<8x32xf32>
    %123 = arith.subf %110, %122 : vector<8x32xf32>
    %cst_29 = arith.constant 9.99999974E-6 : f32
    %124 = vector.broadcast %cst_29 : f32 to vector<8x1xf32>
    %125 = arith.addf %121, %124 : vector<8x1xf32>
    %126 = math.rsqrt %125 : vector<8x1xf32>
    %127 = vector.broadcast %126 : vector<8x1xf32> to vector<8x32xf32>
    %128 = arith.mulf %123, %127 : vector<8x32xf32>
    %129 = vector.broadcast %8 : vector<1x32xf32> to vector<8x32xf32>
    %130 = arith.mulf %128, %129 : vector<8x32xf32>
    %131 = vector.broadcast %9 : vector<1x32xf32> to vector<8x32xf32>
    %132 = arith.addf %130, %131 : vector<8x32xf32>
    %133 = arith.truncf %132 : vector<8x32xf32> to vector<8x32xbf16>
    %c0_30 = arith.constant 0 : index
    %c0_31 = arith.constant 0 : index
    %c0_32 = arith.constant 0 : index
    %134 = vector.load %arg7[%c0_30, %c0_31, %c0_32] : memref<1x32x128xbf16, #tpu.memory_space<vmem>>, vector<1x32x128xbf16>
    %135 = vector.shape_cast %134 : vector<1x32x128xbf16> to vector<32x128xbf16>
    %cst_33 = arith.constant dense<0.000000e+00> : vector<8x128xf32>
    %136 = tpu.matmul %133, %135, %cst_33 {dimension_numbers = #tpu.dot_dimension_numbers<[1], [0], [0], [1], [0, 0, 1, 1], [], []>} : vector<8x32xbf16>, vector<32x128xbf16>, vector<8x128xf32> -> vector<8x128xf32>
    %c0_34 = arith.constant 0 : index
    %c0_35 = arith.constant 0 : index
    %c0_36 = arith.constant 0 : index
    %137 = vector.load %arg8[%c0_34, %c0_35, %c0_36] : memref<1x1x128xf32, #tpu.memory_space<vmem>>, vector<1x1x128xf32>
    %138 = vector.shape_cast %137 : vector<1x1x128xf32> to vector<1x128xf32>
    %139 = vector.broadcast %138 : vector<1x128xf32> to vector<8x128xf32>
    %140 = arith.addf %136, %139 : vector<8x128xf32>
    %cst_37 = arith.constant 0.000000e+00 : f32
    %141 = vector.broadcast %cst_37 : f32 to vector<8x128xf32>
    %142 = arith.maximumf %140, %141 : vector<8x128xf32>
    %143 = arith.truncf %142 : vector<8x128xf32> to vector<8x128xbf16>
    %c0_38 = arith.constant 0 : index
    %c0_39 = arith.constant 0 : index
    %c0_40 = arith.constant 0 : index
    %144 = vector.load %arg9[%c0_38, %c0_39, %c0_40] : memref<1x128x32xbf16, #tpu.memory_space<vmem>>, vector<1x128x32xbf16>
    %145 = vector.shape_cast %144 : vector<1x128x32xbf16> to vector<128x32xbf16>
    %cst_41 = arith.constant dense<0.000000e+00> : vector<8x32xf32>
    %146 = tpu.matmul %143, %145, %cst_41 {dimension_numbers = #tpu.dot_dimension_numbers<[1], [0], [0], [1], [0, 0, 1, 1], [], []>} : vector<8x128xbf16>, vector<128x32xbf16>, vector<8x32xf32> -> vector<8x32xf32>
    %147 = vector.broadcast %11 : vector<1x32xf32> to vector<8x32xf32>
    %148 = arith.addf %146, %147 : vector<8x32xf32>
    %149 = arith.addf %110, %148 : vector<8x32xf32>
    %c0_42 = arith.constant 0 : index
    %c0_43 = arith.constant 0 : index
    %150 = vector.load %arg11[%c0_42, %c0_43] : memref<8x32xf32, #tpu.memory_space<vmem>>, vector<8x32xf32>
    tpu.vector_store %arg11[%c0_42, %c0_43], %149 {strides = array<i32>} : memref<8x32xf32, #tpu.memory_space<vmem>>, vector<8x32xf32>,
    %c0_i32_44 = arith.constant 0 : i32
    %151 = arith.cmpi eq, %arg1, %c0_i32_44 : i32
    %152 = arith.extui %151 : i1 to i32
    %c0_i32_45 = arith.constant 0 : i32
    %153 = arith.cmpi ne, %152, %c0_i32_45 : i32
    scf.if %153 {
      %c0_46 = arith.constant 0 : index
      %c0_47 = arith.constant 0 : index
      %154 = vector.load %arg10[%c0_46, %c0_47] : memref<8x32xf32, #tpu.memory_space<vmem>>, vector<8x32xf32>
      tpu.vector_store %arg10[%c0_46, %c0_47], %149 {strides = array<i32>} : memref<8x32xf32, #tpu.memory_space<vmem>>, vector<8x32xf32>,
    } else {
    }
    return
  }
  func.func @transform_0(%arg0: i32, %arg1: i32) -> (i32, i32) {
    %c0_i32 = arith.constant 0 : i32
    %c0_i32_0 = arith.constant 0 : i32
    return %arg0, %c0_i32 : i32, i32
  }
  func.func @transform_1(%arg0: i32, %arg1: i32) -> (i32, i32, i32) {
    %c0_i32 = arith.constant 0 : i32
    %c0_i32_0 = arith.constant 0 : i32
    %c0_i32_1 = arith.constant 0 : i32
    return %arg1, %c0_i32, %c0_i32_0 : i32, i32, i32
  }
  func.func @transform_2(%arg0: i32, %arg1: i32) -> (i32, i32, i32) {
    %c0_i32 = arith.constant 0 : i32
    %c0_i32_0 = arith.constant 0 : i32
    %c0_i32_1 = arith.constant 0 : i32
    return %arg1, %c0_i32, %c0_i32_0 : i32, i32, i32
  }
  func.func @transform_3(%arg0: i32, %arg1: i32) -> (i32, i32, i32) {
    %c0_i32 = arith.constant 0 : i32
    %c0_i32_0 = arith.constant 0 : i32
    %c0_i32_1 = arith.constant 0 : i32
    return %arg1, %c0_i32, %c0_i32_0 : i32, i32, i32
  }
  func.func @transform_4(%arg0: i32, %arg1: i32) -> (i32, i32, i32) {
    %c0_i32 = arith.constant 0 : i32
    %c0_i32_0 = arith.constant 0 : i32
    %c0_i32_1 = arith.constant 0 : i32
    return %arg1, %c0_i32, %c0_i32_0 : i32, i32, i32
  }
  func.func @transform_5(%arg0: i32, %arg1: i32) -> (i32, i32, i32) {
    %c0_i32 = arith.constant 0 : i32
    %c0_i32_0 = arith.constant 0 : i32
    %c0_i32_1 = arith.constant 0 : i32
    return %arg1, %c0_i32, %c0_i32_0 : i32, i32, i32
  }
  func.func @transform_6(%arg0: i32, %arg1: i32) -> (i32, i32, i32) {
    %c0_i32 = arith.constant 0 : i32
    %c0_i32_0 = arith.constant 0 : i32
    %c0_i32_1 = arith.constant 0 : i32
    return %arg1, %c0_i32, %c0_i32_0 : i32, i32, i32
  }
  func.func @transform_7(%arg0: i32, %arg1: i32) -> (i32, i32, i32) {
    %c0_i32 = arith.constant 0 : i32
    %c0_i32_0 = arith.constant 0 : i32
    %c0_i32_1 = arith.constant 0 : i32
    return %arg1, %c0_i32, %c0_i32_0 : i32, i32, i32
  }
  func.func @transform_8(%arg0: i32, %arg1: i32) -> (i32, i32) {
    %c0_i32 = arith.constant 0 : i32
    %c0_i32_0 = arith.constant 0 : i32
    return %arg0, %c0_i32 : i32, i32
  }
}

</mosaic_0001>

<bundles_post_ra>
// kernel: tpu_custom_call.1
= control target key start
LH: loop header
LB: loop body
LE: loop exit
PB: predicated region body
PF: predicated region fallthrough
CT: control target
= control target key end

     0   :  { %13 = vsyncpa [#allocation4], 0  ;;  %s2179_s0 = inlined_call_operand.vmem [shape: f32[16,32], index: 0, kind: input, shape index: {}]   ;;  %s2180_s1 = inlined_call_operand.vmem [shape: bf16[1,32,96], index: 1, kind: input, shape index: {}]   ;;  %s2181_s2 = inlined_call_operand.vmem [shape: f32[1,1,96], index: 2, kind: input, shape index: {}]   ;;  %s2182_s3 = inlined_call_operand.vmem [shape: bf16[1,32,32], index: 3, kind: input, shape index: {}]   ;;  %s2183_s4 = inlined_call_operand.vmem [shape: f32[1,6,32], index: 4, kind: input, shape index: {}]   ;;  %s2184_s5 = inlined_call_operand.vmem [shape: bf16[1,32,128], index: 5, kind: input, shape index: {}]   ;;  %s2185_s6 = inlined_call_operand.vmem [shape: f32[1,1,128], index: 6, kind: input, shape index: {}]   ;;  %s2186_s7 = inlined_call_operand.vmem [shape: bf16[1,128,32], index: 7, kind: input, shape index: {}]   ;;  %s2187_s8 = inlined_call_operand.hbm [shape: f32[16,32], index: 8, kind: output, shape index: {}]  }
   0x1   :  { %15 = vsyncpa [#allocation4 + $0x1], 0  ;;  %s1875_s27 = smov 0   ;;  %s1877_s28 = smov 0  }
   0x2   :  { %s1879_s29 = smov 0   ;;  %s1881_s30 = smov 0  }
   0x3   :  { %s1883_s9 = smov 0   ;;  %s1885_s10 = smov 0  }
   0x4 LB: > { %s1471_s11 = sadd.s32 4294967295, %s1817_s10   ;;  %s1472_s12 = sadd.s32 4294967294, %s1817_s10   ;;  %s1817_s10 = sphi %s1885_s10, %s21_s10   ;;  %s1813_s9 = sphi %s1883_s9, %s2194_s9   ;;  %s1809_s30 = sphi %s1881_s30, %s2193_s30   ;;  %s1805_s29 = sphi %s1879_s29, %s2192_s29   ;;  %s1801_s28 = sphi %s1877_s28, %s2191_s28   ;;  %s1797_s27 = sphi %s1875_s27, %s2190_s27  }
   0x5   : > { %s33_s13 = sadd.s32 1, %s1813_s9  ;;  %s248_s14 = sadd.s32 1, %s1805_s29 }
   0x6   : > { %p35_p0 = scmp.ge.s32.totalorder %s33_s13, 2  ;;  %p258_p1 = scmp.ne.s32.totalorder %s1805_s29, %s1801_s28 }
   0x7   : > { %p259_p2 = scmp.eq.s32.totalorder %s1471_s11, 1  ;;  %p264_p3 = scmp.ne.s32.totalorder %s1801_s28, %s1797_s27 }
   0x8   : > { %s2196_s13 = smov (%p35_p0, %s33_s13), 0  ;;  %p265_p5 = scmp.eq.s32.totalorder %s1472_s12, 1 }
   0x9   : > { %p1915_p4 = por %p259_p2, %p258_p1  ;;  %s245_s16 = ssub.s32 %s1813_s9, %s2196_s13 }
   0xa   : > { %p1482_p6 = scmp.ge.s32.totalorder %s1817_s10, 1  ;;  %p246_p7 = scmp.eq.s32.totalorder %s245_s16, 0 }
   0xb   : > { %p1922_p8 = por %p265_p5, %p264_p3  ;;  %p341_p9 = scmp.lt.s32.totalorder %s1817_s10, 3 }
   0xc   : > { %s1928_s18 = scalar_select %p246_p7, %s1805_s29, %s248_s14  }
   0xd   : > { %p342_p10 = pnand %p1482_p6, %p341_p9 }
   0xe   : > { %p404_p11 = scmp.lt.s32.totalorder (!%p342_p10), %s1809_s30, 1  ;;  %s1822_s21 = smov (!%p342_p10), 120  }
   0xf   : > { %345 = sbr.rel (%p342_p10) target bundleno = 2522 (0x9da), region = 52  ;;  %s1823_s22 = smov (!%p342_p10), 112  }
  0x10   : > { %s1825_s24 = smov (!%p342_p10), 64   ;;  %s1826_s14 = smov (!%p342_p10), 8  }
  0x11   : > { %s1827_s16 = smov (!%p342_p10), 16   ;;  %s1829_s11 = smov (!%p342_p10), [#allocation3]  }
  0x12   : > { %s1745_s12 = sshll.u32 (!%p342_p10), %s1829_s11, 4  ;;  %s1746_s12 = int_to_ptr.vmem [resolvable:$false] %s1745_s12 }
  0x14   : > { %s405_s19 = scalar_select %p404_p11, %s1809_s30, 1  ;;  %vm444_vm0 = vcmask 261120   ;;  %v1707_v8 = vld [vmem:[%s2180_s1 + $0x8] sm:$0xff]   ;;  %v1819_v9 = vmov 0.0   ;;  %vm1820_vm1 = vmmov 0   ;;  %v1708_v10 = vld [vmem:[%s2180_s1] sm:$0xff]   ;;  %v463_v14 = vlaneseq }
  0x15   : > { %1550 = vmatprep.subr.bf16.mxu0 %v1819_v9  ;;  %1554 = vmatprep.mubr.msk.bf16.mxu0 %vm1820_vm1, %v1819_v9  ;;  %v1963_v17 = vld [vmem:[%s2183_s4] sm:$0x3f]  ;;  %vm557_vm2 = vcmask 64512   ;;  %vm815_vm4 = vcmask 1043456   ;;  %vm1016_vm5 = vcmask 130048   ;;  %vm1018_vm6 = vcmask 195584  }
  0x16   : > { %s1484_s20 = sshll.u32 %s405_s19, 3  ;;  %1551 = vmatpush3.bf16.msra.mxu0 %v1707_v8  ;;  %1570 = vmatprep.subr.bf16.mxu1 %v1819_v9  ;;  %v1957_v15 = vshrl.u32 %v463_v14, 7  ;;  %v1485_v26 = vld [vmem:[%s2181_s2] ss:$0 sm:$0xff]  ;;  %v754_v47 = vand.u32 127, %v463_v14  ;;  %s1828_s19 = smov 24  }
  0x17   : > { %s407_s23 = scalar_lea.vmem %s2179_s0, %s1484_s20  ;;  %1552 = vmatprep.subr.bf16.mxu0 %v1819_v9  ;;  %1572 = vmatprep.mubr.msk.bf16.mxu1 %vm1820_vm1, %v1819_v9  ;;  %s1821_s20 = smov 104  }
  0x18   : > { %v443_v0 = vld [vmem:[%s407_s23] sm:$0xff]  ;;  %v465_v16 = vsub.s32 0, %v1957_v15  ;;  %v470_v18 = vsub.s32 1, %v1957_v15  ;;  %s1824_s23 = smov 96   ;;  %vm755_vm3 = vcmp.ge.s32.totalorder %v1957_v15, %v754_v47 }
  0x19   : > { %445 = vst.msk [vmem:[#allocation2] sm:$0xff] %vm444_vm0, %v443_v0 }
  0x1a   : > { %1553 = vmatpush3.bf16.msra.mxu0 %v1708_v10  ;;  %v466_v19 = vrot.slane %v1963_v17, %v465_v16  ;;  %v471_v22 = vrot.slane %v1963_v17, %v470_v18 }
  0x1b   : > { %1558 = vmatprep.subr.bf16.mxu0 %v1819_v9 }
  0x20   : > { %v1936_v1 = vld [vmem:[#allocation2] sm:$0xff] }
  0x21   : > { %v449_v2 = vsel %vm444_vm0, %v1936_v1, 0.0 }
  0x22   : > { %450 = vadd.xlane.f32.xlu0 %v449_v2 }
  0xab   : > { %v451_v3 = vpop.xlane.xlu0 %450 }
  0xac   : > { %v453_v4 = vmul.f32 0.03125, %v451_v3 }
  0xae   : > { %v454_v5 = vsub.f32 %v1936_v1, %v453_v4 }
  0xb0   : > { %v455_v6 = vmul.f32 %v454_v5, %v454_v5 }
  0xb2   : > { %v456_v7 = vsel %vm444_vm0, %v455_v6, 0.0 }
  0xb3   : > { %457 = vadd.xlane.f32.xlu0 %v456_v7 }
 0x13c   : > { %v458_v11 = vpop.xlane.xlu0 %457 }
 0x13d   : > { %v459_v12 = vmul.f32 0.03125, %v458_v11 }
 0x13f   : > { %v460_v13 = vadd.f32 1e-05, %v459_v12 }
 0x141   : > { %1721 = vrsqrt.f32 %v460_v13 }
 0x14e   : > { %v1722_v20 = vpop.eup %1721 }
 0x14f   : > { %v462_v21 = vmul.f32 %v1722_v20, %v454_v5 }
 0x151   : > { %v467_v23 = vmul.f32 %v466_v19, %v462_v21 }
 0x153   : > { %v472_v24 = vadd.f32 %v471_v22, %v467_v23 }
 0x155   : > { %v473_v25 = vpack.c.bf16 %v472_v24, %v472_v24 }
 0x157   : > { %1555 = vmatmul.mubr.msk.bf16.vlgmr.msra.gmra.mxu0 %vm444_vm0, %v473_v25 }
 0x158   : > { %1560 = vmatprep.mubr.msk.bf16.mxu0 %vm1820_vm1, %v1819_v9 }
 0x217   : > { %v534_v27 = vpop.f32.mrf.mxu0 }
 0x218   : > { %v535_v28 = vadd.f32 %v1485_v26, %v534_v27 }
 0x219   : > { %v1556_v29 = vpop.f32.mrf.mxu0 }
 0x21a   : > { %547 = vrot.lane.b32.xlu0 %v535_v28, %s1821_s20  ;;  %541 = vrot.lane.b32.xlu1 %v535_v28, %s1822_s21  ;;  %v1974_v32 = vpack.c.bf16 %v535_v28, %v535_v28  ;;  %s1513_s20 = sshll.u32 %s1809_s30, 7 }
 0x21b   : > { %v537_v30 = vpop.f32.mrf.mxu0  ;;  %s2131_s25 = scalar_lea.hbm %s2187_s8, %s1513_s20 }
 0x21d   : > { %v1557_v31 = vpop.f32.mrf.mxu0 }
 0x21e   : > { %544 = vrot.lane.b32.xlu1 %v535_v28, %s1823_s22 }
 0x222   : > { %555 = vrot.lane.b32.xlu1 %v1974_v32, %s1824_s23 }
 0x28c   : > { %v542_v33 = vpop.permute.xlu1 %541  ;;  %v548_v37 = vpop.permute.xlu0 %547 }
 0x28d   : > { %v1977_v34 = vpack.c.bf16 %v542_v33, %v542_v33  ;;  %v1983_v39 = vpack.c.bf16 %v548_v37, %v548_v37 }
 0x28f   : > { %605 = vrot.lane.b32.xlu1 %v1977_v34, %s1824_s23 }
 0x290   : > { %v545_v35 = vpop.permute.xlu1 %544 }
 0x291   : > { %v1980_v36 = vpack.c.bf16 %v545_v35, %v545_v35 }
 0x293   : > { %654 = vrot.lane.b32.xlu1 %v1980_v36, %s1824_s23 }
 0x294   : > { %v556_v38 = vpop.permute.xlu1 %555 }
 0x295   : > { %v562_v40 = vsel %vm557_vm2, %v556_v38, 0 }
 0x296   : > { %1559 = vmatpush3.bf16.xpose.msra.mxu0 %v562_v40 }
 0x297   : > { %703 = vrot.lane.b32.xlu1 %v1983_v39, %s1824_s23  ;;  %1564 = vmatprep.subr.bf16.mxu0 %v1819_v9 }
 0x29d   : > { %1561 = vmatmul.mubr.msk.bf16.vlgmr.msra.gmra.mxu0 %vm557_vm2, %v1974_v32 }
 0x29e   : > { %1566 = vmatprep.mubr.msk.bf16.mxu0 %vm1820_vm1, %v1819_v9 }
 0x301   : > { %v606_v41 = vpop.permute.xlu1 %605 }
 0x302   : > { %v611_v42 = vsel %vm557_vm2, %v606_v41, 0 }
 0x303   : > { %1565 = vmatpush3.bf16.xpose.msra.mxu0 %v611_v42 }
 0x304   : > { %1576 = vmatprep.subr.bf16.mxu0 %v1819_v9 }
 0x305   : > { %v655_v43 = vpop.permute.xlu1 %654 }
 0x306   : > { %v660_v44 = vsel %vm557_vm2, %v655_v43, 0 }
 0x307   : > { %1571 = vmatpush3.bf16.xpose.msra.mxu1 %v660_v44 }
 0x308   : > { %1582 = vmatprep.subr.bf16.mxu1 %v1819_v9 }
 0x309   : > { %v704_v45 = vpop.permute.xlu1 %703 }
 0x30a   : > { %v709_v46 = vsel %vm557_vm2, %v704_v45, 0  ;;  %1567 = vmatmul.mubr.msk.bf16.vlgmr.msra.gmra.mxu0 %vm557_vm2, %v1977_v34 }
 0x30b   : > { %1577 = vmatpush3.bf16.xpose.msra.mxu0 %v709_v46  ;;  %1578 = vmatprep.mubr.msk.bf16.mxu0 %vm1820_vm1, %v1819_v9 }
 0x30c   : > { %1588 = vmatprep.subr.bf16.mxu0 %v1819_v9 }
 0x30e   : > { %1573 = vmatmul.mubr.msk.bf16.vlgmr.msra.gmra.mxu1 %vm557_vm2, %v1980_v36 }
 0x30f   : > { %1584 = vmatprep.mubr.msk.bf16.mxu1 %vm1820_vm1, %v1819_v9 }
 0x312   : > { %1579 = vmatmul.mubr.msk.bf16.vlgmr.msra.gmra.mxu0 %vm557_vm2, %v1983_v39 }
 0x313   : > { %1590 = vmatprep.mubr.msk.bf16.mxu0 %vm1820_vm1, %v1819_v9 }
 0x35d   : > { %v598_v48 = vpop.f32.mrf.mxu0 }
 0x35e   : > { %v758_v49 = vsel %vm755_vm3, %v598_v48, -1e+30 }
 0x35f   : > { %v1562_v50 = vpop.f32.mrf.mxu0  ;;  %v762_v51 = vsel %vm557_vm2, %v758_v49, -inf }
 0x360   : > { %763 = vmax.xlane.f32.xlu1 %v762_v51 }
 0x361   : > { %v601_v52 = vpop.f32.mrf.mxu0 }
 0x363   : > { %v1563_v53 = vpop.f32.mrf.mxu0 }
 0x3ca   : > { %v647_v54 = vpop.f32.mrf.mxu0 }
 0x3cb   : > { %v759_v55 = vsel %vm755_vm3, %v647_v54, -1e+30 }
 0x3cc   : > { %v1568_v56 = vpop.f32.mrf.mxu0  ;;  %v765_v57 = vsel %vm557_vm2, %v759_v55, -inf }
 0x3cd   : > { %766 = vmax.xlane.f32.xlu0 %v765_v57 }
 0x3ce   : > { %v650_v58 = vpop.f32.mrf.mxu0  ;;  %v696_v59 = vpop.f32.mrf.mxu1 }
 0x3cf   : > { %v760_v60 = vsel %vm755_vm3, %v696_v59, -1e+30 }
 0x3d0   : > { %v1569_v61 = vpop.f32.mrf.mxu0  ;;  %v1574_v62 = vpop.f32.mrf.mxu1  ;;  %v768_v63 = vsel %vm557_vm2, %v760_v60, -inf }
 0x3d1   : > { %769 = vmax.xlane.f32.xlu1 %v768_v63  ;;  %v1710_v61 = vld [vmem:[%s2182_s3] sm:$0xff]  }
 0x3d2   : > { %v699_v0 = vpop.f32.mrf.mxu1  ;;  %v745_v2 = vpop.f32.mrf.mxu0 }
 0x3d3   : > { %v761_v3 = vsel %vm755_vm3, %v745_v2, -1e+30 }
 0x3d4   : > { %v1575_v4 = vpop.f32.mrf.mxu1  ;;  %v1580_v5 = vpop.f32.mrf.mxu0  ;;  %v771_v6 = vsel %vm557_vm2, %v761_v3, -inf }
 0x3d5   : > { %772 = vmax.xlane.f32.xlu0 %v771_v6 }
 0x3d6   : > { %v748_v7 = vpop.f32.mrf.mxu0 }
 0x3d8   : > { %v1581_v8 = vpop.f32.mrf.mxu0 }
 0x3e2   : > { %810 = vrot.lane.b32.xlu1 %v1974_v32, %s1825_s24 }
 0x3e9   : > { %v764_v10 = vpop.xlane.xlu1 %763 }
 0x3ea   : > { %v774_v11 = vsub.f32 %v758_v49, %v764_v10 }
 0x3ec   : > { %v778_v12 = vmul.f32 1.442695, %v774_v11 }
 0x3ee   : > { %1723 = vpow2.f32 %v778_v12 }
 0x3fb   : > { %v1724_v13 = vpop.eup %1723 }
 0x3fc   : > { %v786_v14 = vsel %vm557_vm2, %v1724_v13, 0.0 }
 0x406   : > { %787 = vadd.xlane.f32.xlu1 %v786_v14 }
 0x456   : > { %v767_v16 = vpop.xlane.xlu0 %766 }
 0x457   : > { %v775_v18 = vsub.f32 %v759_v55, %v767_v16 }
 0x459   : > { %v780_v19 = vmul.f32 1.442695, %v775_v18 }
 0x45a   : > { %v770_v20 = vpop.xlane.xlu1 %769 }
 0x45b   : > { %1725 = vpow2.f32 %v780_v19  ;;  %v776_v21 = vsub.f32 %v760_v60, %v770_v20  ;;  %v1709_v60 = vld [vmem:[%s2182_s3 + $0x8] sm:$0xff]  }
 0x45d   : > { %v782_v22 = vmul.f32 1.442695, %v776_v21  ;;  %v1027_v21 = vsub.s32 4, %v1957_v15 }
 0x45e   : > { %v811_v23 = vpop.permute.xlu1 %810  ;;  %v773_v24 = vpop.xlane.xlu0 %772 }
 0x45f   : > { %1727 = vpow2.f32 %v782_v22  ;;  %v817_v25 = vsel %vm815_vm4, %v811_v23, 0  ;;  %v777_v26 = vsub.f32 %v761_v3, %v773_v24  ;;  %v1028_v22 = vrot.slane %v1963_v17, %v1027_v21 }
 0x460   : > { %1583 = vmatpush3.bf16.msra.mxu1 %v817_v25 }
 0x461   : > { %v784_v27 = vmul.f32 1.442695, %v777_v26  ;;  %1594 = vmatprep.subr.bf16.mxu1 %v1819_v9 }
 0x463   : > { %1729 = vpow2.f32 %v784_v27 }
 0x468   : > { %v1726_v28 = vpop.eup %1725 }
 0x469   : > { %v789_v29 = vsel %vm557_vm2, %v1726_v28, 0.0 }
 0x46a   : > { %790 = vadd.xlane.f32.xlu0 %v789_v29 }
 0x46c   : > { %v1728_v30 = vpop.eup %1727 }
 0x46d   : > { %v792_v31 = vsel %vm557_vm2, %v1728_v30, 0.0 }
 0x46e   : > { %793 = vadd.xlane.f32.xlu1 %v792_v31 }
 0x470   : > { %v1730_v32 = vpop.eup %1729 }
 0x471   : > { %v795_v33 = vsel %vm557_vm2, %v1730_v32, 0.0 }
 0x472   : > { %796 = vadd.xlane.f32.xlu0 %v795_v33 }
 0x47f   : > { %907 = vrot.lane.b32.xlu1 %v1980_v36, %s1825_s24 }
 0x483   : > { %955 = vrot.lane.b32.xlu1 %v1983_v39, %s1825_s24 }
 0x488   : > { %859 = vrot.lane.b32.xlu0 %v1977_v34, %s1825_s24 }
 0x48f   : > { %v788_v35 = vpop.xlane.xlu1 %787 }
 0x490   : > { %1731 = vrcp.f32 %v788_v35 }
 0x49d   : > { %v1732_v37 = vpop.eup %1731 }
 0x49e   : > { %v802_v38 = vmul.f32 %v1732_v37, %v1724_v13  ;;  %v1711_v37 = vld [vmem:[%s2184_s5 + $0x8] sm:$0xff]  }
 0x4a0   : > { %v806_v40 = vpack.c.bf16 %v802_v38, %v802_v38  ;;  %v1713_v38 = vld [vmem:[%s2186_s7 + $0x38] sm:$0xff]  }
 0x4a2   : > { %1585 = vmatmul.mubr.msk.bf16.vlgmr.msra.gmra.mxu1 %vm557_vm2, %v806_v40  ;;  %v1714_v40 = vld [vmem:[%s2186_s7 + $0x30] sm:$0xff]  }
 0x4a3   : > { %1596 = vmatprep.mubr.msk.bf16.mxu1 %vm1820_vm1, %v1819_v9 }
 0x4f3   : > { %v791_v41 = vpop.xlane.xlu0 %790 }
 0x4f4   : > { %1733 = vrcp.f32 %v791_v41  ;;  %v1715_v41 = vld [vmem:[%s2186_s7 + $0x28] sm:$0xff]  }
 0x4f7   : > { %v794_v42 = vpop.xlane.xlu1 %793 }
 0x4f8   : > { %1735 = vrcp.f32 %v794_v42  ;;  %v1716_v42 = vld [vmem:[%s2186_s7 + $0x20] sm:$0xff]  }
 0x4fb   : > { %v908_v36 = vpop.permute.xlu1 %907  ;;  %v797_v43 = vpop.xlane.xlu0 %796 }
 0x4fc   : > { %v913_v39 = vsel %vm815_vm4, %v908_v36, 0  ;;  %1737 = vrcp.f32 %v797_v43  ;;  %v1717_v36 = vld [vmem:[%s2186_s7 + $0x18] sm:$0xff]   ;;  %v1718_v43 = vld [vmem:[%s2186_s7 + $0x10] sm:$0xff]  }
 0x4fd   : > { %1595 = vmatpush3.bf16.msra.mxu1 %v913_v39 }
 0x4fe   : > { %1606 = vmatprep.subr.bf16.mxu1 %v1819_v9 }
 0x4ff   : > { %v860_v34 = vpop.permute.xlu0 %859  ;;  %v956_v47 = vpop.permute.xlu1 %955 }
 0x500   : > { %v865_v44 = vsel %vm815_vm4, %v860_v34, 0  ;;  %v961_v50 = vsel %vm815_vm4, %v956_v47, 0 }
 0x501   : > { %v1734_v45 = vpop.eup %1733  ;;  %1589 = vmatpush3.bf16.msra.mxu0 %v865_v44 }
 0x502   : > { %1600 = vmatprep.subr.bf16.mxu0 %v1819_v9  ;;  %v803_v46 = vmul.f32 %v1734_v45, %v1726_v28  ;;  %v1100_v45 = vsub.s32 2, %v1957_v15 }
 0x504   : > { %v807_v48 = vpack.c.bf16 %v803_v46, %v803_v46  ;;  %v1105_v46 = vsub.s32 3, %v1957_v15  ;;  %v1101_v47 = vrot.slane %v1963_v17, %v1100_v45 }
 0x505   : > { %v1736_v49 = vpop.eup %1735 }
 0x506   : > { %1591 = vmatmul.mubr.msk.bf16.vlgmr.msra.gmra.mxu0 %vm557_vm2, %v807_v48  ;;  %v804_v51 = vmul.f32 %v1736_v49, %v1728_v30 }
 0x507   : > { %1601 = vmatpush3.bf16.msra.mxu0 %v961_v50  ;;  %1602 = vmatprep.mubr.msk.bf16.mxu0 %vm1820_vm1, %v1819_v9  ;;  %v1106_v50 = vrot.slane %v1963_v17, %v1105_v46 }
 0x508   : > { %v808_v52 = vpack.c.bf16 %v804_v51, %v804_v51  ;;  %1614 = vmatprep.subr.bf16.mxu0 %v1819_v9 }
 0x509   : > { %v1738_v53 = vpop.eup %1737 }
 0x50a   : > { %1597 = vmatmul.mubr.msk.bf16.vlgmr.msra.gmra.mxu1 %vm557_vm2, %v808_v52  ;;  %v805_v54 = vmul.f32 %v1738_v53, %v1730_v32 }
 0x50b   : > { %1610 = vmatprep.mubr.msk.bf16.mxu1 %vm1820_vm1, %v1819_v9  ;;  %1607 = vmatpush3.bf16.msra.mxu1 %v1709_v60 }
 0x50c   : > { %v809_v55 = vpack.c.bf16 %v805_v54, %v805_v54  ;;  %1608 = vmatprep.subr.bf16.mxu1 %v1819_v9  ;;  %v1719_v54 = vld [vmem:[%s2186_s7 + $0x8] sm:$0xff]  }
 0x50e   : > { %1603 = vmatmul.mubr.msk.bf16.vlgmr.msra.gmra.mxu0 %vm557_vm2, %v809_v55  ;;  %v1720_v55 = vld [vmem:[%s2186_s7] sm:$0xff]  }
 0x50f   : > { %1618 = vmatprep.mubr.msk.bf16.mxu0 %vm1820_vm1, %v1819_v9  ;;  %1609 = vmatpush3.bf16.msra.mxu1 %v1710_v61 }
 0x510   : > { %1622 = vmatprep.subr.bf16.mxu1 %v1819_v9  ;;  %1615 = vmatpush3.bf16.msra.mxu0 %v1711_v37 }
 0x511   : > { %1616 = vmatprep.subr.bf16.mxu0 %v1819_v9 }
 0x562   : > { %v853_v56 = vpop.f32.mrf.mxu1 }
 0x564   : > { %v1586_v57 = vpop.f32.mrf.mxu1 }
 0x566   : > { %v856_v58 = vpop.f32.mrf.mxu1 }
 0x568   : > { %v1587_v59 = vpop.f32.mrf.mxu1 }
 0x5c6   : > { %v901_v62 = vpop.f32.mrf.mxu0 }
 0x5c7   : > { %1004 = vrot.lane.b32.xlu0 %v901_v62, %s1826_s14  ;;  %s1747_s14 = scalar_lea.vmem %s1746_s12, 256 }
 0x5c8   : > { %v1592_v63 = vpop.f32.mrf.mxu0 }
 0x5ca   : > { %v904_v0 = vpop.f32.mrf.mxu0  ;;  %v949_v2 = vpop.f32.mrf.mxu1 }
 0x5cb   : > { %1008 = vrot.lane.b32.xlu1 %v949_v2, %s1827_s16  ;;  %s401_s16 = sand.u32 1, %s1801_s28  }
 0x5cc   : > { %v1593_v3 = vpop.f32.mrf.mxu0  ;;  %v1598_v4 = vpop.f32.mrf.mxu1  ;;  %s1292_s30 = scalar_lea.sflag [#allocation4], %s401_s16 }
 0x5ce   : > { %v952_v5 = vpop.f32.mrf.mxu1  ;;  %v997_v6 = vpop.f32.mrf.mxu0 }
 0x5cf   : > { %1012 = vrot.lane.b32.xlu0 %v997_v6, %s1828_s19  ;;  %s1483_s19 = sshll.u32 %s401_s16, 3 }
 0x5d0   : > { %v1599_v7 = vpop.f32.mrf.mxu1  ;;  %v1604_v8 = vpop.f32.mrf.mxu0  ;;  %s403_s21 = scalar_lea.vmem [#allocation3], %s1483_s19 }
 0x5d1   : > { %s1305_s22 = sshll.u32 %s403_s21, 4  ;;  %s2133_s22 = int_to_ptr.vmem [resolvable:$true] %s1305_s22 }
 0x5d2   : > { %v1000_v10 = vpop.f32.mrf.mxu0  ;;  %s1741_s26 = scalar_lea.vmem %s2133_s22, 128  ;;  %p1748_p1 = scmp.lt.s32.totalorder %s2133_s22, %s1746_s12 }
 0x5d3   : > { %p1742_p12 = scmp.ne.s32.totalorder %s2133_s22, %s1741_s26  ;;  %p1749_p2 = scmp.lt.s32.totalorder %s1747_s14, %s1741_s26 }
 0x5d4   : > { %v1605_v11 = vpop.f32.mrf.mxu0 }
 0x5d5   : > { %p1743_p13 = pnand %p1742_p12, %p1915_p4  ;;  %p1750_p3 = por %p1749_p2, %p1748_p1 }
 0x5d7   : > { %p1744_p0 = pneg %p1743_p13 }
 0x5d9   : > { %p1751_p5 = pnand %p1750_p3, %p1744_p0 }
 0x639   : > { %v1005_v12 = vpop.permute.xlu0 %1004 }
 0x63a   : > { %v1015_v14 = vsel %vm557_vm2, %v853_v56, %v1005_v12  ;;  %v1500_v56 = vld [vmem:[%s2185_s6] ss:$0 sm:$0xff] }
 0x63d   : > { %v1009_v13 = vpop.permute.xlu1 %1008 }
 0x63e   : > { %v1017_v16 = vsel %vm1016_vm5, %v1015_v14, %v1009_v13 }
 0x641   : > { %v1013_v18 = vpop.permute.xlu0 %1012 }
 0x642   : > { %v1019_v19 = vsel %vm1018_vm6, %v1017_v16, %v1013_v18 }
 0x643   : > { %v1020_v20 = vpack.c.bf16 %v1019_v19, %v1019_v19 }
 0x645   : > { %1611 = vmatmul.mubr.msk.bf16.vlgmr.msra.gmra.mxu1 %vm444_vm0, %v1020_v20 }
 0x646   : > { %1638 = vmatprep.mubr.msk.bf16.mxu1 %vm1820_vm1, %v1819_v9  ;;  %1623 = vmatpush3.bf16.msra.mxu1 %v1713_v38 }
 0x647   : > { %1624 = vmatprep.subr.bf16.mxu1 %v1819_v9 }
 0x64a   : > { %1625 = vmatpush3.bf16.msra.mxu1 %v1714_v40 }
 0x64b   : > { %1626 = vmatprep.subr.bf16.mxu1 %v1819_v9 }
 0x64e   : > { %1627 = vmatpush3.bf16.msra.mxu1 %v1715_v41 }
 0x64f   : > { %1628 = vmatprep.subr.bf16.mxu1 %v1819_v9 }
 0x652   : > { %1629 = vmatpush3.bf16.msra.mxu1 %v1716_v42 }
 0x653   : > { %1630 = vmatprep.subr.bf16.mxu1 %v1819_v9 }
 0x656   : > { %1631 = vmatpush3.bf16.msra.mxu1 %v1717_v36 }
 0x657   : > { %1632 = vmatprep.subr.bf16.mxu1 %v1819_v9 }
 0x65a   : > { %1633 = vmatpush3.bf16.msra.mxu1 %v1718_v43 }
 0x65b   : > { %1634 = vmatprep.subr.bf16.mxu1 %v1819_v9 }
 0x65e   : > { %1635 = vmatpush3.bf16.msra.mxu1 %v1719_v54 }
 0x65f   : > { %1636 = vmatprep.subr.bf16.mxu1 %v1819_v9  ;;  %v1195_v9 = vsub.s32 5, %v1957_v15 }
 0x661   : > { %v1196_v0 = vrot.slane %v1963_v17, %v1195_v9 }
 0x662   : > { %1637 = vmatpush3.bf16.msra.mxu1 %v1720_v55 }
 0x705   : > { %v1078_v23 = vpop.f32.mrf.mxu1 }
 0x706   : > { %v1079_v24 = vadd.f32 %v1078_v23, %v1028_v22 }
 0x707   : > { %v1612_v25 = vpop.f32.mrf.mxu1 }
 0x708   : > { %v2071_v26 = vadd.f32 %v1079_v24, %v1936_v1  ;;  %v1712_v1 = vld [vmem:[%s2184_s5] sm:$0xff]  }
 0x709   : > { %v1081_v27 = vpop.f32.mrf.mxu1  ;;  %1617 = vmatpush3.bf16.msra.mxu0 %v1712_v1 }
 0x70a   : > { %v1085_v28 = vsel %vm444_vm0, %v2071_v26, 0.0 }
 0x70b   : > { %1086 = vadd.xlane.f32.xlu1 %v1085_v28  ;;  %v1613_v29 = vpop.f32.mrf.mxu1 }
 0x794   : > { %v1087_v30 = vpop.xlane.xlu1 %1086 }
 0x795   : > { %v1088_v31 = vmul.f32 0.03125, %v1087_v30 }
 0x797   : > { %v1089_v32 = vsub.f32 %v2071_v26, %v1088_v31 }
 0x799   : > { %v1090_v33 = vmul.f32 %v1089_v32, %v1089_v32 }
 0x79b   : > { %v1091_v35 = vsel %vm444_vm0, %v1090_v33, 0.0 }
 0x79c   : > { %1092 = vadd.xlane.f32.xlu0 %v1091_v35 }
 0x825   : > { %v1093_v39 = vpop.xlane.xlu0 %1092 }
 0x826   : > { %v1094_v34 = vmul.f32 0.03125, %v1093_v39 }
 0x828   : > { %v1095_v44 = vadd.f32 1e-05, %v1094_v34 }
 0x82a   : > { %1739 = vrsqrt.f32 %v1095_v44 }
 0x837   : > { %v1740_v48 = vpop.eup %1739 }
 0x838   : > { %v1097_v49 = vmul.f32 %v1740_v48, %v1089_v32 }
 0x83a   : > { %v1102_v51 = vmul.f32 %v1101_v47, %v1097_v49 }
 0x83c   : > { %v1107_v52 = vadd.f32 %v1106_v50, %v1102_v51 }
 0x83e   : > { %v1108_v53 = vpack.c.bf16 %v1107_v52, %v1107_v52 }
 0x840   : > { %1619 = vmatmul.mubr.msk.bf16.vlgmr.msra.gmra.mxu0 %vm444_vm0, %v1108_v53 }
 0x900   : > { %v1169_v57 = vpop.f32.mrf.mxu0 }
 0x901   : > { %v1170_v58 = vadd.f32 %v1500_v56, %v1169_v57 }
 0x902   : > { %v1620_v59 = vpop.f32.mrf.mxu0 }
 0x903   : > { %v1175_v60 = vmax.f32 %v1170_v58, 0.0 }
 0x904   : > { %v1172_v61 = vpop.f32.mrf.mxu0 }
 0x905   : > { %v1176_v62 = vpack.c.bf16 %v1175_v60, %v1175_v60 }
 0x906   : > { %v1621_v63 = vpop.f32.mrf.mxu0 }
 0x907   : > { %1639 = vmatmul.mubr.bf16.vlgmr.msra.gmra.mxu1 %v1176_v62 }
 0x9c7   : > { %v1279_v2 = vpop.f32.mrf.mxu1 }
 0x9c8   : > { %v1280_v3 = vadd.f32 %v1279_v2, %v1196_v0 }
 0x9c9   : > { %v1640_v4 = vpop.f32.mrf.mxu1 }
 0x9ca   : > { %v1285_v5 = vadd.f32 %v1280_v3, %v2071_v26 }
 0x9cb   : > { %v1282_v15 = vpop.f32.mrf.mxu1 }
 0x9cc   : > { %1286 = vst.msk [vmem:[#allocation2] sm:$0xff] %vm444_vm0, %v1285_v5  ;;  %1290 = vst.msk [vmem:[%s403_s21] sm:$0xff] %vm444_vm0, %v1285_v5 }
 0x9cd   : > { %v1641_v17 = vpop.f32.mrf.mxu1 }
 0x9ce   : > { %1754 = shalt.err (!%p1751_p5)
}
 0x9cf   : > { %s1755_s19 = scalar_lea.hbm %s2131_s25, 128  ;;  %s1759_s21 = scalar_lea.hbm %s2187_s8, 256 }
 0x9d0   : > { %p1756_p6 = scmp.ne.s32.totalorder %s2131_s25, %s1755_s19  ;;  %p1760_p10 = scmp.lt.s32.totalorder %s2131_s25, %s2187_s8 }
 0x9d1   : > { %p1761_p11 = scmp.lt.s32.totalorder %s1759_s21, %s1755_s19 }
 0x9d2   : > { %p1757_p7 = pnand %p1756_p6, %p1915_p4 }
 0x9d3   : > { %p1762_p12 = por %p1761_p11, %p1760_p10 }
 0x9d4   : > { %p1758_p9 = pneg %p1757_p7 }
 0x9d6   : > { %p1763_p13 = pnand %p1762_p12, %p1758_p9 }
 0x9d8   : > { %1766 = shalt.err (!%p1763_p13)
}
 0x9d9   : > { %1642 = dma.vmem_to_hbm [thread:$0]  (%p1915_p4), %s2133_s22, 128, %s2131_s25, %s1292_s30  }
 0x9da PF: > { %p1648_p0 = scmp.ge.s32.totalorder %s1817_s10, 2  ;;  %s1317_s26 = sand.u32 1, %s1797_s27  }
 0x9db   : > { %s1318_s11 = scalar_lea.sflag [#allocation4], %s1317_s26 }
 0x9dc   : > { %p1645_p1 = pnand %p1648_p0, %p1922_p8 }
 0x9de   : > { %p1646_p2 = pneg %p1645_p1 }
 0x9e0   : > { %1792 = dma.done.wait (%p1646_p2), %s1318_s11, 128  }
 0x9e1   : > { %1794 = vsyncadd (%p1646_p2), %s1318_s11, 4294967168  ;;  %s21_s10 = sadd.s32 1, %s1817_s10   ;;  %s2190_s27 = smov %s1801_s28 }
 0x9e2   : > { %p18_p3 = scmp.ge.s32.totalorder %s21_s10, 4   ;;  %s2191_s28 = smov %s1805_s29 }
 0x9e3   : > { %s2192_s29 = smov %s1928_s18  ;;  %s2193_s30 = smov %s1813_s9 }
 0x9e4   : > { %s2194_s9 = smov %s2196_s13  ;;  %20 = sbr.rel (!%p18_p3) target bundleno = 4 (0x4), region = 116 }
 0x9e9   :  { %1323 = vsyncpa [#allocation4], 1 }
 0x9ea   :  { %1325 = vsyncpa [#allocation4 + $0x1], 1 }

</bundles_post_ra>
